<compile_context>
chip_gen: v7x
topology: tpu7x:2x2x1
jax: 0.10.0
libtpu: 0.0.40
codegen_flags: <defaults>
</compile_context>

<pallas_src>
import functools
import math

import jax
import jax.numpy as jnp
from jax.experimental import pallas as pl
from jax.experimental.pallas import tpu as pltpu


def _round_up(x, m):
    return (x + m - 1) // m * m


def _arcface_kernel(labels_ref, logits_ref, out_ref, *, s, cos_m, sin_m, block_cols):
    x = logits_ref[...].astype(jnp.float32)            # (TR, TC)
    lab = labels_ref[...]                               # (TR, 1) int32

    # Column index of every element inside this tile; compare against the
    # label shifted into tile-local coordinates (cheap: scalar op on (TR,1)).
    col = jax.lax.broadcasted_iota(jnp.int32, x.shape, 1)
    lab_local = lab - pl.program_id(1) * block_cols
    is_target = (col == lab_local) & (lab != -1)

    # cos(arccos(x) + m) = x*cos(m) - sin(m)*sqrt(1 - x^2)
    # clamp the sqrt argument so |x| ~ 1 (rounding) cannot produce NaN.
    sin_theta = jnp.sqrt(jnp.maximum(1.0 - x * x, 0.0))
    shifted = x * cos_m - sin_theta * sin_m

    out_ref[...] = (jnp.where(is_target, shifted, x) * s).astype(out_ref.dtype)


def arcface(logits, labels, *, s=64.0, margin=0.5,
            target_tile_bytes=4 * 1024 * 1024,
            max_block_rows=2048, max_block_cols=8192):
    """logits: (N, C) float, labels: (N,) int. Returns (N, C) in logits.dtype."""
    N, C = logits.shape
    out_dtype = logits.dtype
    itemsize = jnp.dtype(out_dtype).itemsize

    cos_m = math.cos(margin)
    sin_m = math.sin(margin)

    # ---- choose a 2-D tiling: (rows on sublanes) x (classes on lanes) ------
    c_pad = _round_up(C, 128)
    if c_pad <= max_block_cols:
        block_cols = c_pad                               # full (padded) width
    else:
        block_cols = 128
        for cand in (8192, 4096, 2048, 1024, 512, 256):
            if cand <= max_block_cols and c_pad % cand == 0:
                block_cols = cand
                break

    rows = target_tile_bytes // (block_cols * itemsize)
    rows = max(8, min(max_block_rows, (rows // 8) * 8))
    block_rows = min(rows, _round_up(N, 8))
    n_pad = _round_up(N, block_rows)

    # ---- pad ragged shapes (padded rows get label=-1, padded cols never hit)
    labels = labels.astype(jnp.int32)
    pad_n, pad_c = n_pad - N, c_pad - C
    x = logits
    if pad_n or pad_c:
        x = jnp.pad(x, ((0, pad_n), (0, pad_c)))
    if pad_n:
        labels = jnp.pad(labels, (0, pad_n), constant_values=-1)
    labels2d = labels.reshape(n_pad, 1)

    grid = (n_pad // block_rows, c_pad // block_cols)

    kernel = functools.partial(_arcface_kernel, s=float(s), cos_m=cos_m,
                               sin_m=sin_m, block_cols=block_cols)

    out = pl.pallas_call(
        kernel,
        out_shape=jax.ShapeDtypeStruct((n_pad, c_pad), out_dtype),
        grid_spec=pltpu.PrefetchScalarGridSpec(
            num_scalar_prefetch=0,
            grid=grid,
            in_specs=[
                # labels: block index independent of j -> DMA only when i changes
                pl.BlockSpec((block_rows, 1), lambda i, j: (i, 0)),
                pl.BlockSpec((block_rows, block_cols), lambda i, j: (i, j)),
            ],
            out_specs=pl.BlockSpec((block_rows, block_cols), lambda i, j: (i, j)),
        ),
        compiler_params=pltpu.CompilerParams(
            dimension_semantics=("parallel", "parallel"),
            vmem_limit_bytes=48 * 1024 * 1024,
        ),
        cost_estimate=pl.CostEstimate(
            flops=6 * n_pad * c_pad,
            transcendentals=0,
            bytes_accessed=2 * n_pad * c_pad * itemsize + 4 * n_pad,
        ),
    )(labels2d, x)

    if pad_n or pad_c:
        out = out[:N, :C]
    return out


def _arcface_ref(logits, labels, *, s=64.0, margin=0.5):
    """Pure-JAX reference mirroring the PyTorch forward (arccos/cos round trip)."""
    N, C = logits.shape
    theta = jnp.arccos(logits)
    col = jnp.arange(C)[None, :]
    is_target = (col == labels[:, None]) & (labels[:, None] != -1)
    theta = jnp.where(is_target, theta + margin, theta)
    return jnp.cos(theta) * s


if __name__ == "__main__":
    key = jax.random.PRNGKey(0)

    # Test 1: aligned small shape (8 samples, 128 classes).
    N, C = 8, 128
    k1, k2 = jax.random.split(key)
    logits = jax.random.uniform(k1, (N, C), dtype=jnp.float32,
                                minval=-0.99, maxval=0.99)
    labels = jax.random.randint(k2, (N,), 0, C, dtype=jnp.int32)
    labels = labels.at[1].set(-1).at[5].set(-1)          # ignored rows

    out = jax.block_until_ready(arcface(logits, labels, s=64.0, margin=0.5))
    ref = _arcface_ref(logits, labels, s=64.0, margin=0.5)
    assert out.shape == (N, C) and out.dtype == jnp.float32
    assert jnp.allclose(out, ref, atol=5e-4, rtol=1e-4), "mismatch vs reference (aligned)"

    # Test 2: ragged shape exercising the padding path (12 samples, 200 classes).
    N2, C2 = 12, 200
    k3, k4 = jax.random.split(k2)
    logits2 = jax.random.uniform(k3, (N2, C2), dtype=jnp.float32,
                                 minval=-0.99, maxval=0.99)
    labels2 = jax.random.randint(k4, (N2,), 0, C2, dtype=jnp.int32)
    labels2 = labels2.at[0].set(-1)

    out2 = jax.block_until_ready(arcface(logits2, labels2, s=64.0, margin=0.5))
    ref2 = _arcface_ref(logits2, labels2, s=64.0, margin=0.5)
    assert out2.shape == (N2, C2) and out2.dtype == jnp.float32
    assert jnp.allclose(out2, ref2, atol=5e-4, rtol=1e-4), "mismatch vs reference (padded)"

    print("KERNEL_OK")
</pallas_src>

<mosaic_0001>
module attributes {stable_mosaic.version = 11 : i64} {
  func.func @_arcface_kernel(%arg0: i32, %arg1: i32, %arg2: memref<8x1xi32, #tpu.memory_space<vmem>>, %arg3: memref<8x128xf32, #tpu.memory_space<vmem>>, %arg4: memref<8x128xf32, #tpu.memory_space<vmem>>) attributes {dimension_semantics = [#tpu.dimension_semantics<parallel>, #tpu.dimension_semantics<parallel>], iteration_bounds = array<i64: 1, 1>, scalar_prefetch = 0 : i64, scratch_operands = 0 : i64, tpu.core_type = #tpu.core_type<tc>, window_params = [{transform_indices = @transform_0, window_bounds = array<i64: 8, 1>}, {transform_indices = @transform_1, window_bounds = array<i64: 8, 128>}, {transform_indices = @transform_2, window_bounds = array<i64: 8, 128>}]} {
    %c0 = arith.constant 0 : index
    %c0_0 = arith.constant 0 : index
    %0 = vector.load %arg3[%c0, %c0_0] : memref<8x128xf32, #tpu.memory_space<vmem>>, vector<8x128xf32>
    %c0_1 = arith.constant 0 : index
    %c0_2 = arith.constant 0 : index
    %1 = vector.load %arg2[%c0_1, %c0_2] : memref<8x1xi32, #tpu.memory_space<vmem>>, vector<8x1xi32>
    %2 = tpu.iota {dimensions = array<i32: 1>} : vector<8x128xi32>
    %c128_i32 = arith.constant 128 : i32
    %3 = arith.muli %arg1, %c128_i32 : i32
    %4 = vector.broadcast %3 : i32 to vector<8x1xi32>
    %5 = arith.subi %1, %4 : vector<8x1xi32>
    %6 = vector.broadcast %5 : vector<8x1xi32> to vector<8x128xi32>
    %7 = arith.cmpi eq, %2, %6 : vector<8x128xi32>
    %c-1_i32 = arith.constant -1 : i32
    %8 = vector.broadcast %c-1_i32 : i32 to vector<8x1xi32>
    %9 = arith.cmpi ne, %1, %8 : vector<8x1xi32>
    %10 = vector.broadcast %9 : vector<8x1xi1> to vector<8x128xi1>
    %11 = arith.andi %7, %10 : vector<8x128xi1>
    %12 = arith.mulf %0, %0 : vector<8x128xf32>
    %cst = arith.constant 1.000000e+00 : f32
    %13 = vector.broadcast %cst : f32 to vector<8x128xf32>
    %14 = arith.subf %13, %12 : vector<8x128xf32>
    %cst_3 = arith.constant 0.000000e+00 : f32
    %15 = vector.broadcast %cst_3 : f32 to vector<8x128xf32>
    %16 = arith.maximumf %14, %15 : vector<8x128xf32>
    %17 = math.sqrt %16 : vector<8x128xf32>
    %cst_4 = arith.constant 0.87758255 : f32
    %18 = vector.broadcast %cst_4 : f32 to vector<8x128xf32>
    %19 = arith.mulf %0, %18 : vector<8x128xf32>
    %cst_5 = arith.constant 0.47942555 : f32
    %20 = vector.broadcast %cst_5 : f32 to vector<8x128xf32>
    %21 = arith.mulf %17, %20 : vector<8x128xf32>
    %22 = arith.subf %19, %21 : vector<8x128xf32>
    %23 = arith.select %11, %22, %0 : vector<8x128xi1>, vector<8x128xf32>
    %cst_6 = arith.constant 6.400000e+01 : f32
    %24 = vector.broadcast %cst_6 : f32 to vector<8x128xf32>
    %25 = arith.mulf %23, %24 : vector<8x128xf32>
    %c0_7 = arith.constant 0 : index
    %c0_8 = arith.constant 0 : index
    %26 = vector.load %arg4[%c0_7, %c0_8] : memref<8x128xf32, #tpu.memory_space<vmem>>, vector<8x128xf32>
    tpu.vector_store %arg4[%c0_7, %c0_8], %25 {strides = array<i32>} : memref<8x128xf32, #tpu.memory_space<vmem>>, vector<8x128xf32>,
    return
  }
  func.func @transform_0(%arg0: i32, %arg1: i32) -> (i32, i32) {
    %c0_i32 = arith.constant 0 : i32
    %c0_i32_0 = arith.constant 0 : i32
    return %arg0, %c0_i32 : i32, i32
  }
  func.func @transform_1(%arg0: i32, %arg1: i32) -> (i32, i32) {
    %c0_i32 = arith.constant 0 : i32
    return %arg0, %arg1 : i32, i32
  }
  func.func @transform_2(%arg0: i32, %arg1: i32) -> (i32, i32) {
    %c0_i32 = arith.constant 0 : i32
    return %arg0, %arg1 : i32, i32
  }
}

</mosaic_0001>

<bundles_post_ra>
// kernel: tpu_custom_call.1
= control target key start
LH: loop header
LB: loop body
LE: loop exit
PB: predicated region body
PF: predicated region fallthrough
CT: control target
= control target key end

     0   :  { %s124_s0 = inlined_call_operand.vmem [shape: s32[8,1], index: 0, kind: input, shape index: {}]   ;;  %s125_s1 = inlined_call_operand.vmem [shape: f32[8,128], index: 1, kind: input, shape index: {}]   ;;  %s126_s2 = inlined_call_operand.hbm [shape: f32[8,128], index: 2, kind: output, shape index: {}]  }
   0x1   :  { %v13_v0 = vld [vmem:[%s124_s0] sm:$0xff] }
   0x2   :  { %7 = vsyncpa [#allocation3], 0  ;;  %v89_v1 = vmov 0   ;;  %vm23_vm0 = vcmp.ne.s32.totalorder %v13_v0, 4294967295  ;;  %v12_v3 = vld [vmem:[%s125_s1] sm:$0xff]  ;;  %v14_v12 = vlaneseq  ;;  %s90_s0 = smov [#allocation2]  }
   0x3   :  { %62 = vset.pattern.permute.xlu0 %v89_v1  ;;  %v24_v2 = vsel %vm23_vm0, 1, %v89_v1  ;;  %v30_v4 = vmul.f32 %v12_v3, %v12_v3  ;;  %v40_v13 = vmul.f32 0.87758255, %v12_v3  ;;  %s52_s1 = sshll.u32 %s90_s0, 4  ;;  %s53_s1 = int_to_ptr.vmem [resolvable:$true] %s52_s1 }
   0x4   :  { %20 = vperm.xlu0 %62, %v13_v0   ;;  %v15_v16 = vand.u32 127, %v14_v12  ;;  %s65_s13 = scalar_lea.vmem %s53_s1, 128  ;;  %p70_p1 = scmp.lt.s32.totalorder %s53_s1, %s53_s1 }
   0x5   :  { %v31_v5 = vsub.f32 1.0, %v30_v4  ;;  %p66_p0 = scmp.ne.s32.totalorder %s53_s1, %s65_s13  ;;  %p71_p2 = scmp.lt.s32.totalorder %s65_s13, %s65_s13 }
   0x7   :  { %v32_v6 = vmax.f32 %v31_v5, 0.0  ;;  %p72_p3 = por %p71_p2, %p70_p1 }
   0x8   :  { %26 = vperm.xlu0 %62, %v24_v2  }
   0x9   :  { %63 = vrsqrt.f32 %v32_v6  ;;  %vm35_vm1 = vcmp.eq.f32.partialorder %v32_v6, inf  ;;  %v38_v9 = vand.u32 2147483648, %v32_v6  ;;  %vm37_vm2 = vcmp.eq.f32.partialorder %v32_v6, 0.0  ;;  %p73_p4 = pnand %p72_p3, %p66_p0 }
  0x13   :  { %v64_v7 = vpop.eup %63 }
  0x14   :  { %v34_v8 = vmul.f32 %v64_v7, %v32_v6 }
  0x16   :  { %v36_v10 = vsel %vm35_vm1, %v32_v6, %v34_v8 }
  0x17   :  { %v39_v11 = vsel %vm37_vm2, %v38_v9, %v36_v10 }
  0x18   :  { %v41_v14 = vmul.f32 0.47942555, %v39_v11 }
  0x1a   :  { %v42_v17 = vsub.f32 %v40_v13, %v41_v14 }
  0x83   :  { %v21_v15 = vpop.permute.xlu0 %20 }
  0x84   :  { %vm22_vm3 = vcmp.eq.s32.totalorder %v15_v16, %v21_v15 }
  0x87   :  { %v27_v18 = vpop.permute.xlu0 %26 }
  0x88   :  { %vm28_vm4 = vcmp.eq.s32.totalorder %v27_v18, 1 }
  0x89   :  { %vm29_vm5 = vmand %vm22_vm3, %vm28_vm4 }
  0x8a   :  { %v43_v19 = vsel %vm29_vm5, %v42_v17, %v12_v3 }
  0x8b   :  { %v44_v20 = vmul.f32 64.0, %v43_v19 }
  0x8d   :  { %45 = vst [vmem:[#allocation2] sm:$0xff] %v44_v20 }
  0x8e   :  { %76 = shalt.err (!%p73_p4)
}
  0x8f   :  { %s77_s16 = scalar_lea.hbm %s126_s2, 128 }
  0x90   :  { %p78_p5 = scmp.ne.s32.totalorder %s126_s2, %s77_s16  ;;  %p81_p6 = scmp.lt.u32.totalorder %s77_s16, %s126_s2 }
  0x92   :  { %p83_p7 = pnand %p81_p6, %p78_p5 }
  0x94   :  { %86 = shalt.err (!%p83_p7)
}
  0x95   :  { %55 = dma.vmem_to_hbm [thread:$0]  %s53_s1, 128, %s126_s2, [#allocation3]  }
  0x96   :  { %87 = dma.done.wait [#allocation3], 128  }
  0x97   :  { %88 = vsyncadd [#allocation3], 4294967168 }
  0x98   :  { %59 = vsyncpa [#allocation3], 1 }

</bundles_post_ra>
